<compile_context>
chip_gen: v5e
topology: v5e:2x2
jax: 0.10.0
libtpu: 0.0.40
codegen_flags: <defaults>
</compile_context>

<pallas_src>
import functools
import math

import jax
import jax.numpy as jnp
from jax import lax
from jax.experimental import pallas as pl
from jax.experimental.pallas import tpu as pltpu


# Fits every current generation (v7x physical VMEM is 64 MiB); raise / re-derive per
# generation once L-tiling is added.
_VMEM_LIMIT = 64 * 1024 * 1024


def _snake(x, alpha):
    """Snake1d: x + 1/(a+eps) * sin(a x)^2, with sin^2 = 0.5*(1 - cos(2 a x)).

    alpha: (C, 1) f32.  Exact reciprocal (per-channel vector -> negligible cost).
    f32 throughout (v5e-safe); a bf16-EUP variant of the cos is a per-generation
    option for v6e/v7x.
    """
    two_a = 2.0 * alpha
    half_inv = 0.5 / (alpha + 1e-9)
    return x + half_inv * (1.0 - jnp.cos(two_a * x))


def _im2col_store(col_ref, src_bf16, c: int, l_out: int, l_in: int,
                  ksize: int, dilation: int, pad: int):
    """Write the im2col of `src_bf16` (c, l_in) into col_ref ((ksize*c, l_out), bf16).

    Only the halo strips are zero-filled; every element of col_ref is covered
    (interior copy + halo zeros), so the scratch never needs a full memset.
    """
    for k in range(ksize):                                   # static unroll
        off = k * dilation - pad
        t0 = max(0, -off)
        t1 = min(l_out, l_in - off)
        r0 = k * c
        if t0 > 0:
            col_ref[r0:r0 + c, 0:t0] = jnp.zeros((c, t0), jnp.bfloat16)
        if t1 < l_out:
            col_ref[r0:r0 + c, t1:l_out] = jnp.zeros((c, l_out - t1), jnp.bfloat16)
        if t1 > t0:
            col_ref[r0:r0 + c, t0:t1] = src_bf16[:, t0 + off:t1 + off]


# ----------------------------------------------------------------------------
# Kernel 1: generic fused [Snake1d ->] Conv1d (stride 1, any K / dilation / pad)
#   Used for the input conv (no snake) , the final head (snake + k=3), and the
#   polyphase-rearranged downsample conv (no snake, k=2).
# ----------------------------------------------------------------------------
def _snake_conv_kernel(x_ref, a_ref, w_ref, b_ref, o_ref, col_ref, *,
                       ksize: int, dilation: int, pad: int, apply_snake: bool):
    # x_ref  : (1, C_in, L_in) f32
    # a_ref  : (C_in, 1) f32          (unused when apply_snake=False)
    # w_ref  : (C_out, ksize*C_in) bf16, column index = k*C_in + c_in
    # b_ref  : (C_out, 1) f32
    # o_ref  : (1, C_out, L_out) f32
    # col_ref: (ksize*C_in, L_out) bf16 scratch
    c_in, l_in = x_ref.shape[1], x_ref.shape[2]
    l_out = o_ref.shape[2]

    x = x_ref[0]
    if apply_snake:
        x = _snake(x, a_ref[...])
    xb = x.astype(jnp.bfloat16)

    _im2col_store(col_ref, xb, c_in, l_out, l_in, ksize, dilation, pad)

    y = jnp.dot(w_ref[...], col_ref[...], preferred_element_type=jnp.float32)
    o_ref[0] = (y + b_ref[...]).astype(o_ref.dtype)


def snake_conv_pallas(x, alpha, w_mat, b_col, *, ksize: int, dilation: int = 1,
                      pad: int = 0, apply_snake: bool = True):
    """x: (B, C_in, L_in) f32.  w_mat: (C_out, ksize*C_in) bf16 (precomputed).
    alpha: (C_in, 1) f32 or None.  b_col: (C_out, 1) f32."""
    B, C_in, L_in = x.shape
    C_out = w_mat.shape[0]
    L_out = L_in + 2 * pad - dilation * (ksize - 1)
    if alpha is None:
        alpha = jnp.ones((C_in, 1), jnp.float32)

    kernel = functools.partial(_snake_conv_kernel, ksize=ksize, dilation=dilation,
                               pad=pad, apply_snake=apply_snake)
    return pl.pallas_call(
        kernel,
        out_shape=jax.ShapeDtypeStruct((B, C_out, L_out), jnp.float32),
        grid_spec=pltpu.PrefetchScalarGridSpec(
            num_scalar_prefetch=0,
            grid=(B,),
            in_specs=[
                pl.BlockSpec((1, C_in, L_in), lambda b: (b, 0, 0)),     # x
                pl.BlockSpec((C_in, 1), lambda b: (0, 0)),              # alpha
                pl.BlockSpec((C_out, ksize * C_in), lambda b: (0, 0)),  # w (bf16)
                pl.BlockSpec((C_out, 1), lambda b: (0, 0)),             # b
            ],
            out_specs=pl.BlockSpec((1, C_out, L_out), lambda b: (b, 0, 0)),
            scratch_shapes=[pltpu.VMEM((ksize * C_in, L_out), jnp.bfloat16)],
        ),
        compiler_params=pltpu.CompilerParams(
            dimension_semantics=("parallel",),
            vmem_limit_bytes=_VMEM_LIMIT),
    )(x, alpha, w_mat, b_col)


# ----------------------------------------------------------------------------
# Kernel 2: fused EncoderBlock body
#   [ ResidualUnit(d=1) -> ResidualUnit(d=3) -> ResidualUnit(d=9) -> Snake1d ]
#   One HBM read + one HBM write of the (C, L) activation for the whole block.
# ----------------------------------------------------------------------------
def _encoder_block_kernel(x_ref, a1_ref, w1_ref, b1_ref, a2_ref, w2_ref, b2_ref,
                          af_ref, o_ref, col_ref, *, dilations):
    # x_ref  : (1, C, L) f32
    # a1/a2  : (3, C, 1) f32 snake alphas per residual unit
    # w1     : (3, C, 7*C) bf16, column index = k*C + c_in
    # b1/b2  : (3, C, 1) f32
    # w2     : (3, C, C) bf16 pointwise convs
    # af     : (C, 1) f32   (snake before the downsample conv)
    # o_ref  : (1, C, L) f32  (snake-activated output, pre-downsample)
    # col_ref: (7*C, L) bf16 scratch, reused by the three units
    C, L = x_ref.shape[1], x_ref.shape[2]
    x = x_ref[0]                                             # (C, L) f32

    for u, d in enumerate(dilations):                        # static unroll (3 units)
        s1 = _snake(x, a1_ref[u]).astype(jnp.bfloat16)
        _im2col_store(col_ref, s1, C, L, L, 7, d, 3 * d)
        y1 = jnp.dot(w1_ref[u], col_ref[...],
                     preferred_element_type=jnp.float32) + b1_ref[u]
        s2 = _snake(y1, a2_ref[u]).astype(jnp.bfloat16)
        y2 = jnp.dot(w2_ref[u], s2,
                     preferred_element_type=jnp.float32) + b2_ref[u]
        x = x + y2                                           # residual

    o_ref[0] = _snake(x, af_ref[...]).astype(o_ref.dtype)


def encoder_block_pallas(x, blk):
    """x: (B, C, L) f32.  blk holds stacked, pre-transformed per-unit params."""
    B, C, L = x.shape
    kernel = functools.partial(_encoder_block_kernel, dilations=(1, 3, 9))
    return pl.pallas_call(
        kernel,
        out_shape=jax.ShapeDtypeStruct((B, C, L), jnp.float32),
        grid_spec=pltpu.PrefetchScalarGridSpec(
            num_scalar_prefetch=0,
            grid=(B,),
            in_specs=[
                pl.BlockSpec((1, C, L), lambda b: (b, 0, 0)),        # x
                pl.BlockSpec((3, C, 1), lambda b: (0, 0, 0)),        # alpha1 (stacked)
                pl.BlockSpec((3, C, 7 * C), lambda b: (0, 0, 0)),    # w1 bf16
                pl.BlockSpec((3, C, 1), lambda b: (0, 0, 0)),        # b1
                pl.BlockSpec((3, C, 1), lambda b: (0, 0, 0)),        # alpha2
                pl.BlockSpec((3, C, C), lambda b: (0, 0, 0)),        # w2 bf16
                pl.BlockSpec((3, C, 1), lambda b: (0, 0, 0)),        # b2
                pl.BlockSpec((C, 1), lambda b: (0, 0)),              # final snake alpha
            ],
            out_specs=pl.BlockSpec((1, C, L), lambda b: (b, 0, 0)),
            scratch_shapes=[pltpu.VMEM((7 * C, L), jnp.bfloat16)],
        ),
        compiler_params=pltpu.CompilerParams(
            dimension_semantics=("parallel",),
            vmem_limit_bytes=_VMEM_LIMIT),
    )(x, blk["A1"], blk["W1"], blk["B1"], blk["A2"], blk["W2"], blk["B2"], blk["AF"])


def downsample_conv_pallas(s, blk, *, stride: int):
    """WNConv1d(C, 2C, kernel=2*stride, stride, pad=ceil(stride/2)) on the already
    snake-activated block output `s`.

    The strided conv is rewritten as a stride-1 kernel-size-2 conv over a polyphase
    rearrangement of `s` (the rearrangement is a pure layout permutation, so it is
    exact).  TODO(synk): fold this wrapper rearrangement + the k=2 conv into the
    fused block kernel once lane-strided VMEM reads are validated on Mosaic.
    """
    B, C, L = s.shape
    S = stride
    p = math.ceil(S / 2)
    K = 2 * S
    L_out = (L + 2 * p - K) // S + 1
    Lp = S * (L_out + 1)                      # covers every tap the conv reads
    pad_right = Lp - p - L
    if pad_right >= 0:
        sp = jnp.pad(s, ((0, 0), (0, 0), (p, pad_right)))
    else:
        sp = jnp.pad(s, ((0, 0), (0, 0), (p, 0)))[:, :, :Lp]
    # sr[b, c*S + r, m] = sp[b, c, m*S + r]
    sr = sp.reshape(B, C, L_out + 1, S).transpose(0, 1, 3, 2).reshape(B, C * S, L_out + 1)
    return snake_conv_pallas(sr, None, blk["Wd"], blk["Bd"], ksize=2, dilation=1,
                             pad=0, apply_snake=False)


# ----------------------------------------------------------------------------
# Full encoder forward
# ----------------------------------------------------------------------------
def encoder_pallas(x, prep):
    """x: (B, 1, L) f32 -> (B, d_latent, L / prod(strides))."""
    h = snake_conv_pallas(x, None, prep["conv0_wmat"], prep["conv0_b"],
                          ksize=7, dilation=1, pad=3, apply_snake=False)
    for blk in prep["blocks"]:
        s = encoder_block_pallas(h, blk)                       # 3 RUs + snake, fused
        h = downsample_conv_pallas(s, blk, stride=blk["stride"])
    return snake_conv_pallas(h, prep["final_alpha"], prep["final_wmat"],
                             prep["final_b"], ksize=3, dilation=1, pad=1,
                             apply_snake=True)


# ----------------------------------------------------------------------------
# Parameter construction (weight-norm folded) and one-time kernel-layout prep.
# ----------------------------------------------------------------------------
def make_encoder_params(key, d_model, strides, d_latent):
    # TODO(synk): weight_norm's (g, v) reparameterization is folded here into
    # effective weights (inference-equivalent to remove_weight_norm); it is
    # parameter glue, not kernel work.
    keys = iter(jax.random.split(key, 64))

    def wnconv(c_in, c_out, k):
        kv, kg, kb = jax.random.split(next(keys), 3)
        v = jax.random.normal(kv, (c_out, c_in, k), jnp.float32)
        g = 0.5 + jax.random.uniform(kg, (c_out, 1, 1), jnp.float32)
        n = jnp.sqrt(jnp.sum(v * v, axis=(1, 2), keepdims=True))
        return g * v / n, 0.1 * jax.random.normal(kb, (c_out,), jnp.float32)

    def snake_alpha(c):
        return 0.5 + jax.random.uniform(next(keys), (c,), jnp.float32)

    params = {"strides": tuple(strides)}
    params["conv0_w"], params["conv0_b"] = wnconv(1, d_model, 7)
    blocks = []
    c = d_model
    for s in strides:
        c_out = 2 * c
        res_units = []
        for _dil in (1, 3, 9):
            a1 = snake_alpha(c)
            w1, b1 = wnconv(c, c, 7)
            a2 = snake_alpha(c)
            w2, b2 = wnconv(c, c, 1)
            res_units.append((a1, w1, b1, a2, w2, b2))
        blk = {"res_units": res_units, "down_alpha": snake_alpha(c)}
        blk["down_w"], blk["down_b"] = wnconv(c, c_out, 2 * s)
        blocks.append(blk)
        c = c_out
    params["blocks"] = blocks
    params["final_alpha"] = snake_alpha(c)
    params["final_w"], params["final_b"] = wnconv(c, d_latent, 3)
    return params


def prepare_encoder_params(params):
    """One-time weight transforms to kernel layout (bf16 matrices, stacked per-unit
    params, polyphase downsample weights) -- no per-forward reshapes/casts."""
    prep = {"strides": params["strides"]}
    d_model = params["conv0_w"].shape[0]
    prep["conv0_wmat"] = (jnp.transpose(params["conv0_w"], (0, 2, 1))
                          .reshape(d_model, 7).astype(jnp.bfloat16))
    prep["conv0_b"] = params["conv0_b"].reshape(d_model, 1).astype(jnp.float32)

    blocks = []
    for blk, S in zip(params["blocks"], params["strides"]):
        C = blk["res_units"][0][0].shape[0]
        C_out = blk["down_w"].shape[0]
        A1 = jnp.stack([ru[0].reshape(C, 1) for ru in blk["res_units"]]).astype(jnp.float32)
        W1 = jnp.stack([jnp.transpose(ru[1], (0, 2, 1)).reshape(C, 7 * C)
                        for ru in blk["res_units"]]).astype(jnp.bfloat16)
        B1 = jnp.stack([ru[2].reshape(C, 1) for ru in blk["res_units"]]).astype(jnp.float32)
        A2 = jnp.stack([ru[3].reshape(C, 1) for ru in blk["res_units"]]).astype(jnp.float32)
        W2 = jnp.stack([ru[4][:, :, 0] for ru in blk["res_units"]]).astype(jnp.bfloat16)
        B2 = jnp.stack([ru[5].reshape(C, 1) for ru in blk["res_units"]]).astype(jnp.float32)
        AF = blk["down_alpha"].reshape(C, 1).astype(jnp.float32)
        # polyphase weights: wr[co, c*S + r, q] = w[co, c, q*S + r]
        wr = (blk["down_w"].reshape(C_out, C, 2, S).transpose(0, 1, 3, 2)
              .reshape(C_out, C * S, 2))
        Wd = jnp.transpose(wr, (0, 2, 1)).reshape(C_out, 2 * C * S).astype(jnp.bfloat16)
        Bd = blk["down_b"].reshape(C_out, 1).astype(jnp.float32)
        blocks.append(dict(A1=A1, W1=W1, B1=B1, A2=A2, W2=W2, B2=B2, AF=AF,
                           Wd=Wd, Bd=Bd, stride=S))
    prep["blocks"] = blocks

    Cf = params["final_w"].shape[1]
    d_latent = params["final_w"].shape[0]
    prep["final_alpha"] = params["final_alpha"].reshape(Cf, 1).astype(jnp.float32)
    prep["final_wmat"] = (jnp.transpose(params["final_w"], (0, 2, 1))
                          .reshape(d_latent, 3 * Cf).astype(jnp.bfloat16))
    prep["final_b"] = params["final_b"].reshape(d_latent, 1).astype(jnp.float32)
    return prep


# ----------------------------------------------------------------------------
# Pure-JAX reference (mirrors the kernels' bf16-operand / f32-accumulate matmuls).
# ----------------------------------------------------------------------------
def _snake_ref(x, alpha):
    a = alpha.reshape(1, -1, 1)
    return x + (1.0 / (a + 1e-9)) * jnp.sin(a * x) ** 2


def _conv1d_ref(x, w_eff, b, *, stride=1, dilation=1, pad=0):
    y = lax.conv_general_dilated(
        x.astype(jnp.bfloat16), w_eff.astype(jnp.bfloat16),
        window_strides=(stride,), padding=[(pad, pad)],
        rhs_dilation=(dilation,),
        dimension_numbers=("NCH", "OIH", "NCH"),
        preferred_element_type=jnp.float32)
    return y + b.reshape(1, -1, 1)


def encoder_ref(x, params):
    h = _conv1d_ref(x, params["conv0_w"], params["conv0_b"], pad=3)
    for blk, stride in zip(params["blocks"], params["strides"]):
        for (a1, w1, b1, a2, w2, b2), dil in zip(blk["res_units"], (1, 3, 9)):
            y = _snake_ref(h, a1)
            y = _conv1d_ref(y, w1, b1, dilation=dil, pad=3 * dil)
            y = _snake_ref(y, a2)
            y = _conv1d_ref(y, w2, b2)
            h = h + y
        y = _snake_ref(h, blk["down_alpha"])
        h = _conv1d_ref(y, blk["down_w"], blk["down_b"], stride=stride,
                        pad=math.ceil(stride / 2))
    y = _snake_ref(h, params["final_alpha"])
    return _conv1d_ref(y, params["final_w"], params["final_b"], pad=1)


if __name__ == "__main__":
    # Small Encoder consistent with the module: d_model=8, strides=(2,2), d_latent=8.
    d_model, strides, d_latent = 8, (2, 2), 8
    B, L = 2, 64

    key = jax.random.PRNGKey(0)
    kx, kp = jax.random.split(key)
    x = jax.random.normal(kx, (B, 1, L), jnp.float32)
    params = make_encoder_params(kp, d_model, strides, d_latent)
    prep = prepare_encoder_params(params)

    out = jax.block_until_ready(encoder_pallas(x, prep))
    ref = jax.block_until_ready(encoder_ref(x, params))

    L_out = L // (strides[0] * strides[1])
    assert out.shape == (B, d_latent, L_out), out.shape
    err = float(jnp.max(jnp.abs(out - ref)))
    scale = float(jnp.maximum(1.0, jnp.max(jnp.abs(ref))))
    # bf16 matmul operands perturb numerics slightly vs an f32 reference path.
    assert err <= 5e-2 * scale, f"max abs err {err} vs ref scale {scale}"
    print("KERNEL_OK")
</pallas_src>

<mosaic_0001>
module attributes {stable_mosaic.version = 11 : i64} {
  func.func @_snake_conv_kernel(%arg0: i32, %arg1: memref<1x1x64xf32, #tpu.memory_space<vmem>>, %arg2: memref<1x1xf32, #tpu.memory_space<vmem>>, %arg3: memref<8x7xbf16, #tpu.memory_space<vmem>>, %arg4: memref<8x1xf32, #tpu.memory_space<vmem>>, %arg5: memref<1x8x64xf32, #tpu.memory_space<vmem>>, %arg6: memref<7x64xbf16, #tpu.memory_space<vmem>>) attributes {dimension_semantics = [#tpu.dimension_semantics<parallel>], iteration_bounds = array<i64: 2>, scalar_prefetch = 0 : i64, scratch_operands = 1 : i64, tpu.core_type = #tpu.core_type<tc>, window_params = [{transform_indices = @transform_0, window_bounds = array<i64: 1, 1, 64>}, {pipeline_mode = #tpu.pipeline_mode<synchronous>, transform_indices = @transform_1, window_bounds = array<i64: 1, 1>}, {pipeline_mode = #tpu.pipeline_mode<synchronous>, transform_indices = @transform_2, window_bounds = array<i64: 8, 7>}, {pipeline_mode = #tpu.pipeline_mode<synchronous>, transform_indices = @transform_3, window_bounds = array<i64: 8, 1>}, {transform_indices = @transform_4, window_bounds = array<i64: 1, 8, 64>}]} {
    %c0 = arith.constant 0 : index
    %c0_0 = arith.constant 0 : index
    %c0_1 = arith.constant 0 : index
    %0 = vector.load %arg1[%c0, %c0_0, %c0_1] : memref<1x1x64xf32, #tpu.memory_space<vmem>>, vector<1x1x64xf32>
    %1 = vector.shape_cast %0 : vector<1x1x64xf32> to vector<1x64xf32>
    %2 = arith.truncf %1 : vector<1x64xf32> to vector<1x64xbf16>
    %cst = arith.constant 0.000000e+00 : bf16
    %3 = vector.broadcast %cst : bf16 to vector<1x3xbf16>
    %c0_2 = arith.constant 0 : index
    %c0_3 = arith.constant 0 : index
    %4 = vector.load %arg6[%c0_2, %c0_3] : memref<7x64xbf16, #tpu.memory_space<vmem>>, vector<1x3xbf16>
    tpu.vector_store %arg6[%c0_2, %c0_3], %3 {strides = array<i32>} : memref<7x64xbf16, #tpu.memory_space<vmem>>, vector<1x3xbf16>,
    %5 = vector.extract_strided_slice %2 {offsets = [0, 0], sizes = [1, 61], strides = [1, 1]} : vector<1x64xbf16> to vector<1x61xbf16>
    %c0_4 = arith.constant 0 : index
    %c3 = arith.constant 3 : index
    %6 = vector.load %arg6[%c0_4, %c3] : memref<7x64xbf16, #tpu.memory_space<vmem>>, vector<1x61xbf16>
    tpu.vector_store %arg6[%c0_4, %c3], %5 {strides = array<i32>} : memref<7x64xbf16, #tpu.memory_space<vmem>>, vector<1x61xbf16>,
    %cst_5 = arith.constant 0.000000e+00 : bf16
    %7 = vector.broadcast %cst_5 : bf16 to vector<1x2xbf16>
    %c1 = arith.constant 1 : index
    %c0_6 = arith.constant 0 : index
    %8 = vector.load %arg6[%c1, %c0_6] : memref<7x64xbf16, #tpu.memory_space<vmem>>, vector<1x2xbf16>
    tpu.vector_store %arg6[%c1, %c0_6], %7 {strides = array<i32>} : memref<7x64xbf16, #tpu.memory_space<vmem>>, vector<1x2xbf16>,
    %9 = vector.extract_strided_slice %2 {offsets = [0, 0], sizes = [1, 62], strides = [1, 1]} : vector<1x64xbf16> to vector<1x62xbf16>
    %c1_7 = arith.constant 1 : index
    %c2 = arith.constant 2 : index
    %10 = vector.load %arg6[%c1_7, %c2] : memref<7x64xbf16, #tpu.memory_space<vmem>>, vector<1x62xbf16>
    tpu.vector_store %arg6[%c1_7, %c2], %9 {strides = array<i32>} : memref<7x64xbf16, #tpu.memory_space<vmem>>, vector<1x62xbf16>,
    %cst_8 = arith.constant 0.000000e+00 : bf16
    %11 = vector.broadcast %cst_8 : bf16 to vector<1x1xbf16>
    %c2_9 = arith.constant 2 : index
    %c0_10 = arith.constant 0 : index
    %12 = vector.load %arg6[%c2_9, %c0_10] : memref<7x64xbf16, #tpu.memory_space<vmem>>, vector<1x1xbf16>
    tpu.vector_store %arg6[%c2_9, %c0_10], %11 {strides = array<i32>} : memref<7x64xbf16, #tpu.memory_space<vmem>>, vector<1x1xbf16>,
    %13 = vector.extract_strided_slice %2 {offsets = [0, 0], sizes = [1, 63], strides = [1, 1]} : vector<1x64xbf16> to vector<1x63xbf16>
    %c2_11 = arith.constant 2 : index
    %c1_12 = arith.constant 1 : index
    %14 = vector.load %arg6[%c2_11, %c1_12] : memref<7x64xbf16, #tpu.memory_space<vmem>>, vector<1x63xbf16>
    tpu.vector_store %arg6[%c2_11, %c1_12], %13 {strides = array<i32>} : memref<7x64xbf16, #tpu.memory_space<vmem>>, vector<1x63xbf16>,
    %c3_13 = arith.constant 3 : index
    %c0_14 = arith.constant 0 : index
    %15 = vector.load %arg6[%c3_13, %c0_14] : memref<7x64xbf16, #tpu.memory_space<vmem>>, vector<1x64xbf16>
    tpu.vector_store %arg6[%c3_13, %c0_14], %2 {strides = array<i32>} : memref<7x64xbf16, #tpu.memory_space<vmem>>, vector<1x64xbf16>,
    %cst_15 = arith.constant 0.000000e+00 : bf16
    %16 = vector.broadcast %cst_15 : bf16 to vector<1x1xbf16>
    %c4 = arith.constant 4 : index
    %c63 = arith.constant 63 : index
    %17 = vector.load %arg6[%c4, %c63] : memref<7x64xbf16, #tpu.memory_space<vmem>>, vector<1x1xbf16>
    tpu.vector_store %arg6[%c4, %c63], %16 {strides = array<i32>} : memref<7x64xbf16, #tpu.memory_space<vmem>>, vector<1x1xbf16>,
    %18 = vector.extract_strided_slice %2 {offsets = [0, 1], sizes = [1, 63], strides = [1, 1]} : vector<1x64xbf16> to vector<1x63xbf16>
    %c4_16 = arith.constant 4 : index
    %c0_17 = arith.constant 0 : index
    %19 = vector.load %arg6[%c4_16, %c0_17] : memref<7x64xbf16, #tpu.memory_space<vmem>>, vector<1x63xbf16>
    tpu.vector_store %arg6[%c4_16, %c0_17], %18 {strides = array<i32>} : memref<7x64xbf16, #tpu.memory_space<vmem>>, vector<1x63xbf16>,
    %cst_18 = arith.constant 0.000000e+00 : bf16
    %20 = vector.broadcast %cst_18 : bf16 to vector<1x2xbf16>
    %c5 = arith.constant 5 : index
    %c62 = arith.constant 62 : index
    %21 = vector.load %arg6[%c5, %c62] : memref<7x64xbf16, #tpu.memory_space<vmem>>, vector<1x2xbf16>
    tpu.vector_store %arg6[%c5, %c62], %20 {strides = array<i32>} : memref<7x64xbf16, #tpu.memory_space<vmem>>, vector<1x2xbf16>,
    %22 = vector.extract_strided_slice %2 {offsets = [0, 2], sizes = [1, 62], strides = [1, 1]} : vector<1x64xbf16> to vector<1x62xbf16>
    %c5_19 = arith.constant 5 : index
    %c0_20 = arith.constant 0 : index
    %23 = vector.load %arg6[%c5_19, %c0_20] : memref<7x64xbf16, #tpu.memory_space<vmem>>, vector<1x62xbf16>
    tpu.vector_store %arg6[%c5_19, %c0_20], %22 {strides = array<i32>} : memref<7x64xbf16, #tpu.memory_space<vmem>>, vector<1x62xbf16>,
    %cst_21 = arith.constant 0.000000e+00 : bf16
    %24 = vector.broadcast %cst_21 : bf16 to vector<1x3xbf16>
    %c6 = arith.constant 6 : index
    %c61 = arith.constant 61 : index
    %25 = vector.load %arg6[%c6, %c61] : memref<7x64xbf16, #tpu.memory_space<vmem>>, vector<1x3xbf16>
    tpu.vector_store %arg6[%c6, %c61], %24 {strides = array<i32>} : memref<7x64xbf16, #tpu.memory_space<vmem>>, vector<1x3xbf16>,
    %26 = vector.extract_strided_slice %2 {offsets = [0, 3], sizes = [1, 61], strides = [1, 1]} : vector<1x64xbf16> to vector<1x61xbf16>
    %c6_22 = arith.constant 6 : index
    %c0_23 = arith.constant 0 : index
    %27 = vector.load %arg6[%c6_22, %c0_23] : memref<7x64xbf16, #tpu.memory_space<vmem>>, vector<1x61xbf16>
    tpu.vector_store %arg6[%c6_22, %c0_23], %26 {strides = array<i32>} : memref<7x64xbf16, #tpu.memory_space<vmem>>, vector<1x61xbf16>,
    %c0_24 = arith.constant 0 : index
    %c0_25 = arith.constant 0 : index
    %28 = vector.load %arg3[%c0_24, %c0_25] : memref<8x7xbf16, #tpu.memory_space<vmem>>, vector<8x7xbf16>
    %c0_26 = arith.constant 0 : index
    %c0_27 = arith.constant 0 : index
    %29 = vector.load %arg6[%c0_26, %c0_27] : memref<7x64xbf16, #tpu.memory_space<vmem>>, vector<7x64xbf16>
    %cst_28 = arith.constant dense<0.000000e+00> : vector<8x64xf32>
    %30 = tpu.matmul %28, %29, %cst_28 {dimension_numbers = #tpu.dot_dimension_numbers<[1], [0], [0], [1], [0, 0, 1, 1], [], []>} : vector<8x7xbf16>, vector<7x64xbf16>, vector<8x64xf32> -> vector<8x64xf32>
    %c0_29 = arith.constant 0 : index
    %c0_30 = arith.constant 0 : index
    %31 = vector.load %arg4[%c0_29, %c0_30] : memref<8x1xf32, #tpu.memory_space<vmem>>, vector<8x1xf32>
    %32 = vector.broadcast %31 : vector<8x1xf32> to vector<8x64xf32>
    %33 = arith.addf %30, %32 : vector<8x64xf32>
    %c0_31 = arith.constant 0 : index
    %c0_32 = arith.constant 0 : index
    %c0_33 = arith.constant 0 : index
    %34 = vector.load %arg5[%c0_31, %c0_32, %c0_33] : memref<1x8x64xf32, #tpu.memory_space<vmem>>, vector<1x8x64xf32>
    %35 = vector.shape_cast %34 : vector<1x8x64xf32> to vector<8x64xf32>
    %36 = vector.shape_cast %33 : vector<8x64xf32> to vector<1x8x64xf32>
    tpu.vector_store %arg5[%c0_31, %c0_32, %c0_33], %36 {strides = array<i32>} : memref<1x8x64xf32, #tpu.memory_space<vmem>>, vector<1x8x64xf32>,
    return
  }
  func.func @transform_0(%arg0: i32) -> (i32, i32, i32) {
    %c0_i32 = arith.constant 0 : i32
    %c0_i32_0 = arith.constant 0 : i32
    %c0_i32_1 = arith.constant 0 : i32
    return %arg0, %c0_i32, %c0_i32_0 : i32, i32, i32
  }
  func.func @transform_1(%arg0: i32) -> (i32, i32) {
    %c0_i32 = arith.constant 0 : i32
    %c0_i32_0 = arith.constant 0 : i32
    %c0_i32_1 = arith.constant 0 : i32
    return %c0_i32, %c0_i32_0 : i32, i32
  }
  func.func @transform_2(%arg0: i32) -> (i32, i32) {
    %c0_i32 = arith.constant 0 : i32
    %c0_i32_0 = arith.constant 0 : i32
    %c0_i32_1 = arith.constant 0 : i32
    return %c0_i32, %c0_i32_0 : i32, i32
  }
  func.func @transform_3(%arg0: i32) -> (i32, i32) {
    %c0_i32 = arith.constant 0 : i32
    %c0_i32_0 = arith.constant 0 : i32
    %c0_i32_1 = arith.constant 0 : i32
    return %c0_i32, %c0_i32_0 : i32, i32
  }
  func.func @transform_4(%arg0: i32) -> (i32, i32, i32) {
    %c0_i32 = arith.constant 0 : i32
    %c0_i32_0 = arith.constant 0 : i32
    %c0_i32_1 = arith.constant 0 : i32
    return %arg0, %c0_i32, %c0_i32_0 : i32, i32, i32
  }
}

</mosaic_0001>

<bundles_post_ra>
// kernel: tpu_custom_call.1
= control target key start
LH: loop header
LB: loop body
LE: loop exit
PB: predicated region body
PF: predicated region fallthrough
CT: control target
= control target key end

     0   :  { %11 = vsyncpa [#allocation5], 0  ;;  %s660_s0 = inlined_call_operand.vmem [shape: f32[2,1,64], index: 0, kind: input, shape index: {}]   ;;  %s661_s1 = inlined_call_operand.<no memory space> [shape: f32[1,1], index: 1, kind: input, shape index: {}]   ;;  %s662_s2 = inlined_call_operand.vmem [shape: bf16[8,7], index: 2, kind: input, shape index: {}]   ;;  %s663_s3 = inlined_call_operand.vmem [shape: f32[8,1], index: 3, kind: input, shape index: {}]   ;;  %s664_s4 = inlined_call_operand.hbm [shape: f32[2,8,64], index: 4, kind: output, shape index: {}]  }
   0x1   :  { %13 = vsyncpa [#allocation5 + $0x1], 0  ;;  %s556_s15 = smov 0   ;;  %s558_s16 = smov 0  }
   0x2   :  { %s560_s17 = smov 0   ;;  %s562_s18 = smov 0  }
   0x3 LB: > { %s577_s1 = sadd.s32 4294967295, %s521_s18   ;;  %s401_s19 = sadd.s32 4294967294, %s521_s18   ;;  %s521_s18 = sphi %s562_s18, %s670_s18   ;;  %s517_s17 = sphi %s560_s17, %s669_s17   ;;  %s513_s16 = sphi %s558_s16, %s668_s16   ;;  %s509_s15 = sphi %s556_s15, %s667_s15  }
   0x4   : > { %s581_s20 = sadd.s32 1, %s521_s18   ;;  %s115_s21 = sadd.s32 1, %s517_s17 }
   0x5   : > { %s112_s22 = ssub.s32 %s521_s18, %s581_s20  ;;  %p125_p0 = scmp.ne.s32.totalorder %s517_s17, %s513_s16 }
   0x6   : > { %p113_p1 = scmp.eq.s32.totalorder %s112_s22, 0  ;;  %p126_p2 = scmp.eq.s32.totalorder %s577_s1, 1 }
   0x7   : > { %p131_p3 = scmp.ne.s32.totalorder %s513_s16, %s509_s15  ;;  %p132_p4 = scmp.eq.s32.totalorder %s401_s19, 1 }
   0x8   : > { %s592_s23 = scalar_select %p113_p1, %s517_s17, %s115_s21  }
   0x9   : > { %p594_p5 = por %p126_p2, %p125_p0  ;;  %p598_p6 = por %p132_p4, %p131_p3 }
   0xa   : > { %p404_p7 = scmp.ge.s32.totalorder %s521_s18, 1  ;;  %p165_p8 = scmp.lt.s32.totalorder %s521_s18, 3 }
   0xc   : > { %p166_p9 = pnand %p404_p7, %p165_p8 }
   0xd   : > { %p189_p10 = scmp.lt.s32.totalorder (!%p166_p9), %s577_s1, 1  ;;  %s523_s30 = smov (!%p166_p9), 3  }
   0xe   : > { %169 = sbr.rel (%p166_p9) target bundleno = 314 (0x13a), region = 36  ;;  %s524_s5 = smov (!%p166_p9), 1  }
   0xf   : > { %s525_s6 = smov (!%p166_p9), 126   ;;  %s526_s7 = smov (!%p166_p9), 127  }
  0x10   : > { %s527_s8 = smov (!%p166_p9), 2   ;;  %s528_s9 = smov (!%p166_p9), 125  }
  0x11   : > { %s186_s14 = sand.u32 (!%p166_p9), 1, %s513_s16   ;;  %s408_s19 = sshll.u32 (!%p166_p9), %s577_s1, 3 }
  0x12   : > { %s405_s21 = sshll.u32 (!%p166_p9), %s186_s14, 3  ;;  %s340_s27 = scalar_lea.hbm (!%p166_p9), %s664_s4, %s408_s19 }
  0x13   : > { %vm195_vm0 = vcmask 16384   ;;  %vm196_vm1 = vsmask.f32 256  ;;  %v198_v0 = vld [vmem:[#allocation2] sm:$0x1]  ;;  %s190_s26 = scalar_select %p189_p10, %s577_s1, 1 }
  0x14   : > { %vm197_vm2 = vmand %vm195_vm0, %vm196_vm1  ;;  %vm250_vm3 = vcmask 518650   ;;  %vm251_vm4 = vsmask.f32 2304  ;;  %v253_v9 = vld [vmem:[#allocation2] sm:$0x4]  ;;  %vm227_vm6 = vcmask 1025  }
  0x15   : > { %v199_v1 = vsel %vm197_vm2, 0, %v198_v0  ;;  %s191_s29 = scalar_lea.vmem %s660_s0, %s190_s26  ;;  %vm252_vm5 = vmand %vm250_vm3, %vm251_vm4  ;;  %vm228_vm7 = vsmask.f32 1280  ;;  %v230_v11 = vld [vmem:[#allocation2] sm:$0x2]  ;;  %vm280_vm9 = vcmask 519659  }
  0x16   : > { %200 = vst [vmem:[#allocation2] sm:$0x1] %v199_v1  ;;  %v193_v2 = vld [vmem:[%s191_s29] sm:$0x1]  ;;  %v254_v10 = vsel %vm252_vm5, 0, %v253_v9  ;;  %vm229_vm8 = vmand %vm227_vm6, %vm228_vm7  ;;  %vm290_vm12 = vcmask 494595  }
  0x17   : > { %v194_v3 = vpack.c.bf16 %v193_v2, %v193_v2  ;;  %255 = vst [vmem:[#allocation2] sm:$0x4] %v254_v10  ;;  %v231_v12 = vsel %vm229_vm8, 0, %v230_v11  ;;  %vm281_vm10 = vsmask.f32 3328  ;;  %vm205_vm14 = vcmask 516120  }
  0x18   : > { %232 = vst [vmem:[#allocation2] sm:$0x2] %v231_v12  ;;  %v283_v13 = vld [vmem:[#allocation2] sm:$0x8]  ;;  %vm282_vm11 = vmand %vm280_vm9, %vm281_vm10  ;;  %vm237_vm15 = vcmask 517129   ;;  %vm260_vm3 = vcmask 509954  }
  0x19   : > { %202 = vrot.lane.b32.xlu0 %v194_v3, %s523_s30  ;;  %v233_v4 = vrot.slane %v194_v3, 7  ;;  %v610_v5 = vshll.u32 %v194_v3, 16  ;;  %v256_v7 = vrot.slane %v194_v3, 6  ;;  %v286_v8 = vrot.slane %v194_v3, 5  ;;  %vm291_vm13 = vmand %vm290_vm12, %vm281_vm10  ;;  %v297_v30 = vld [vmem:[%s663_s3] sm:$0xff]  ;;  %s188_s28 = scalar_lea.vmem [#allocation4], %s405_s21 }
  0x1a   : > { %v284_v15 = vsel %vm282_vm11, 0, %v283_v13  ;;  %vm206_vm0 = vmand %vm205_vm14, %vm196_vm1  ;;  %vm210_vm5 = vcmask 8192   ;;  %vm211_vm6 = vsmask.f32 7938  ;;  %vm244_vm9 = vcmask 517121   ;;  %s342_s29 = sshll.u32 %s188_s28, 4  ;;  %s343_s29 = int_to_ptr.vmem [resolvable:$true] %s342_s29 }
  0x1b   : > { %234 = vrot.lane.b32.xlu1 %v233_v4, %s524_s5  ;;  %v271_v6 = vrot.slane %v610_v5, 6  ;;  %285 = vst [vmem:[#allocation2] sm:$0x8] %v284_v15  ;;  %vm238_vm2 = vmand %vm237_vm15, %vm228_vm7  ;;  %vm245_vm10 = vsmask.f32 7942  ;;  %v242_v26 = vrot.slane %v610_v5, 7 }
  0x1c   : > { %vm261_vm8 = vmand %vm260_vm3, %vm251_vm4  ;;  %v529_v32 = vmov 0   ;;  %vm265_vm4 = vcmask 518642   ;;  %vm266_vm11 = vsmask.f32 7946  ;;  %vm222_vm12 = vcmask 516112   ;;  %s344_s30 = sshll.u32 %s340_s27, 4  ;;  %s345_s30 = int_to_ptr.hbm [resolvable:$true] %s344_s30 }
  0x1d   : > { %272 = vrot.lane.b32.xlu2 %v271_v6, %s525_s6  ;;  %v207_v19 = vld [vmem:[#allocation2] sm:$0x1]  ;;  %vm212_vm1 = vmand %vm210_vm5, %vm211_vm6  ;;  %458 = vset.pattern.permute.xlu0 %v529_v32  ;;  %vm275_vm15 = vcmask 501762   ;;  %vm308_vm3 = vcmask 1043456   ;;  %v530_v42 = vmov 65535   ;;  %vm303_vm5 = vcmask 56320  }
  0x1e   : > { %v262_v25 = vld [vmem:[#allocation2] sm:$0x4]  ;;  %vm246_vm7 = vmand %vm244_vm9, %vm245_vm10  ;;  %s330_s5 = scalar_lea.sflag [#allocation5], %s186_s14  ;;  %s473_s6 = sshra.s32 %s345_s30, 4  ;;  %s474_s6 = int_to_ptr.hbm [resolvable:$true] %s473_s6 }
  0x1f   : > { %v239_v21 = vld [vmem:[#allocation2] sm:$0x2]  ;;  %vm223_vm14 = vmand %vm222_vm12, %vm211_vm6  ;;  %vm327_vm6 = vcmask 523264   ;;  %s475_s1 = scalar_lea.hbm %s474_s6, 8  ;;  %p480_p0 = scmp.lt.s32.totalorder %s474_s6, %s664_s4 }
  0x20   : > { %v295_v47 = vld [vmem:[%s662_s2] sm:$0xf]  ;;  %p476_p11 = scmp.ne.s32.totalorder %s474_s6, %s475_s1 }
  0x21   : > { %257 = vrot.lane.b32.xlu0 %v256_v7, %s526_s7 }
  0x22   : > { %v292_v17 = vld [vmem:[#allocation2] sm:$0x8]  ;;  %p477_p12 = pnand %p476_p11, %p594_p5 }
  0x23   : > { %219 = vrot.lane.b32.xlu1 %v610_v5, %s527_s8 }
  0x24   : > { %p478_p13 = pneg %p477_p12 }
  0x25   : > { %287 = vrot.lane.b32.xlu2 %v286_v8, %s528_s9  ;;  %s479_s9 = scalar_lea.hbm %s664_s4, 16 }
  0x26   : > { %p481_p1 = scmp.lt.s32.totalorder %s479_s9, %s475_s1 }
  0x28   : > { %p482_p2 = por %p481_p1, %p480_p0 }
  0x29   : > { %300 = vperm.xlu0 %458, %v297_v30  }
  0x2a   : > { %p483_p3 = pnand %p482_p2, %p478_p13 }
  0x77   : > { %v273_v14 = vpop.permute.xlu2 %272 }
  0x7f   : > { %v288_v16 = vpop.permute.xlu2 %287 }
  0x80   : > { %v293_v18 = vsel %vm291_vm13, %v288_v16, %v292_v17  ;;  %vm267_vm13 = vmand %vm265_vm4, %vm266_vm11 }
  0x81   : > { %294 = vst [vmem:[#allocation2] sm:$0x8] %v293_v18 }
  0x8b   : > { %v203_v20 = vpop.permute.xlu0 %202 }
  0x8c   : > { %v208_v22 = vsel %vm206_vm0, %v203_v20, %v207_v19  ;;  %vm276_vm0 = vmand %vm275_vm15, %vm266_vm11 }
  0x8d   : > { %209 = vst [vmem:[#allocation2] sm:$0x1] %v208_v22  ;;  %v235_v23 = vpop.permute.xlu1 %234 }
  0x8e   : > { %v240_v24 = vsel %vm238_vm2, %v235_v23, %v239_v21  ;;  %vm307_vm2 = vcmask 1042432  }
  0x8f   : > { %241 = vst [vmem:[#allocation2] sm:$0x2] %v240_v24  ;;  %v309_v43 = vsel %vm307_vm2, 4294967295, %v530_v42 }
  0x90   : > { %v310_v44 = vsel %vm308_vm3, %v309_v43, 0 }
  0x93   : > { %v258_v27 = vpop.permute.xlu0 %257 }
  0x94   : > { %v263_v28 = vsel %vm261_vm8, %v258_v27, %v262_v25  ;;  %v213_v29 = vld [vmem:[#allocation2] sm:$0x1] }
  0x95   : > { %264 = vst [vmem:[#allocation2] sm:$0x4] %v263_v28  ;;  %v214_v31 = vsel %vm212_vm1, 0, %v213_v29  ;;  %v220_v35 = vpop.permute.xlu1 %219 }
  0x96   : > { %v247_v33 = vld [vmem:[#allocation2] sm:$0x2]  ;;  %215 = vst [vmem:[#allocation2] sm:$0x1] %v214_v31 }
  0x97   : > { %v248_v34 = vsel %vm246_vm7, %v242_v26, %v247_v33 }
  0x98   : > { %249 = vst [vmem:[#allocation2] sm:$0x2] %v248_v34 }
  0x9b   : > { %v301_v48 = vpop.permute.xlu0 %300 }
  0x9c   : > { %v268_v36 = vld [vmem:[#allocation2] sm:$0x4] }
  0x9d   : > { %v224_v37 = vld [vmem:[#allocation2] sm:$0x1]  ;;  %v269_v38 = vsel %vm267_vm13, 0, %v268_v36 }
  0x9e   : > { %v225_v39 = vsel %vm223_vm14, %v220_v35, %v224_v37  ;;  %270 = vst [vmem:[#allocation2] sm:$0x4] %v269_v38 }
  0x9f   : > { %226 = vst [vmem:[#allocation2] sm:$0x1] %v225_v39 }
  0xa5   : > { %v277_v40 = vld [vmem:[#allocation2] sm:$0x4] }
  0xa6   : > { %v278_v41 = vsel %vm276_vm0, %v273_v14, %v277_v40 }
  0xa7   : > { %279 = vst [vmem:[#allocation2] sm:$0x4] %v278_v41 }
  0xae   : > { %v296_v45 = vld [vmem:[#allocation2] sm:$0xf] }
  0xaf   : > { %v312_v46 = vand.u32 %v310_v44, %v296_v45 }
  0xb1   : > { %321 = vmatpush.bf16.msra.mxu0 %v312_v46 }
  0xb4   : > { %406 = vmatmul.msk.bf16.vlgmr.msra.gmra.mxu0 %vm303_vm5, %v295_v47 }
 0x131   : > { %v323_v49 = vpop.f32.mrf.mxu0 }
 0x132   : > { %v324_v50 = vadd.f32 %v323_v49, %v301_v48 }
 0x134   : > { %328 = vst.msk [vmem:[%s188_s28] sm:$0xff] %vm327_vm6, %v324_v50 }
 0x135   : > { %486 = shalt.err (!%p483_p3)
}
 0x136   : > { %411 = dma.vmem_to_hbm [thread:$0]  (%p594_p5), %s343_s29, 128, %s345_s30, %s330_s5  }
 0x139   : > { %v325_v51 = vpop.f32.mrf.mxu0 }
 0x13a PF: > { %p417_p4 = scmp.ge.s32.totalorder %s521_s18, 2  ;;  %s356_s12 = sand.u32 1, %s509_s15  }
 0x13b   : > { %s357_s13 = scalar_lea.sflag [#allocation5], %s356_s12 }
 0x13c   : > { %p414_p7 = pnand %p417_p4, %p598_p6 }
 0x13e   : > { %p415_p8 = pneg %p414_p7 }
 0x140   : > { %504 = dma.done.wait (%p415_p8), %s357_s13, 128  }
 0x141   : > { %506 = vsyncadd (%p415_p8), %s357_s13, 4294967168  ;;  %p16_p9 = scmp.ge.s32.totalorder %s581_s20, 4   ;;  %s667_s15 = smov %s513_s16 }
 0x142   : > { %s668_s16 = smov %s517_s17  ;;  %s669_s17 = smov %s592_s23 }
 0x143   : > { %s670_s18 = smov %s581_s20  ;;  %18 = sbr.rel (!%p16_p9) target bundleno = 3 (0x3), region = 71 }
 0x148   :  { %363 = vsyncpa [#allocation5], 1 }
 0x149   :  { %365 = vsyncpa [#allocation5 + $0x1], 1 }

</bundles_post_ra>
